<compile_context>
chip_gen: v7x
topology: tpu7x:2x2x1
jax: 0.10.0
libtpu: 0.0.40
codegen_flags: <defaults>
</compile_context>

<pallas_src>
import jax
import jax.numpy as jnp
from jax.experimental import pallas as pl
from jax.experimental.pallas import tpu as pltpu


def _round_up(x, m):
    return (x + m - 1) // m * m


# ----------------------------------------------------------------------------
# Fused kernel: GRU over time + online masked mean pooling + 2-layer MLP head.
# One grid step processes one batch tile (time-major slab [L*Bt, D]) -> [Bt, OUT].
# ----------------------------------------------------------------------------
def fused_dynamic_filter_kernel(
    tmax_ref,                            # SMEM [n_tiles] int32 (scalar prefetch): per-tile max len
    x_ref,                               # [L*Bt, D] compute dtype, time-major within the tile
    len_ref,                             # [Bt, 1] int32
    wih_ref,                             # [D, 3H] compute dtype (r|z|n)
    big_ref,                             # [1, 3H] f32 : (b_ir+b_hr | b_iz+b_hz | b_in)
    whh_ref,                             # [H, 3H] compute dtype
    bhn_ref,                             # [1, H]  f32 : b_hn (applied inside r * (...))
    w1_ref, b1_ref, w2_ref, b2_ref,      # head MLP params
    out_ref,                             # [Bt, OUT] f32
    g_s,                                 # VMEM scratch [L*Bt, 3H] f32 (gate pre-activations)
):
    H3 = whh_ref.shape[1]
    H = H3 // 3
    Bt = out_ref.shape[0]
    LBt = x_ref.shape[0]
    L = LBt // Bt
    cdt = x_ref.dtype

    # ---- Hoisted input projection: one wide MXU pass for all timesteps & all three gates.
    # Rows are time-major: row index = t*Bt + b.  r/z hidden biases folded here; b_hn cannot be.
    g_s[...] = (jnp.dot(x_ref[...], wih_ref[...], preferred_element_type=jnp.float32)
                + big_ref[...])

    whh = whh_ref[...]
    bhn_b = jnp.broadcast_to(bhn_ref[...], (Bt, H))       # hoisted (no broadcast CSE in loops)
    lens = len_ref[...]                                   # [Bt, 1] int32

    # Per-tile max sequence length (SMEM scalar) bounds the serial recurrence.
    t_max = tmax_ref[pl.program_id(0)]

    h0 = jnp.zeros((Bt, H), jnp.float32)
    acc0 = jnp.zeros((Bt, H), jnp.float32)

    def step(t, carry):
        h, acc = carry
        base = pl.multiple_of(t * Bt, 8)                  # contiguous, sublane-aligned rows
        gi = g_s[pl.ds(base, Bt), :]                      # [Bt, 3H]  (plain vld, no stride)
        hh = jnp.dot(h.astype(cdt), whh,
                     preferred_element_type=jnp.float32)  # [Bt, 3H]  single MXU op per step
        rz = jax.nn.sigmoid(gi[:, :2 * H] + hh[:, :2 * H])
        r = rz[:, :H]
        z = rz[:, H:]
        n = jnp.tanh(gi[:, 2 * H:] + r * (hh[:, 2 * H:] + bhn_b))
        h_new = (1.0 - z) * n + z * h
        # Online masked-sum pooling: only timesteps t < length contribute.
        valid = (t < lens).astype(jnp.float32)            # [Bt, 1]
        return h_new, acc + valid * h_new

    _, acc = jax.lax.fori_loop(0, t_max, step, (h0, acc0))

    # ---- masked mean pooling (exact divide; tiny [Bt,1] op, keeps parity tight)
    inv_len = 1.0 / jnp.maximum(lens.astype(jnp.float32), 1.0)
    pooled = acc * inv_len                                # [Bt, H]

    # ---- head MLP: Linear -> ReLU -> Linear
    hid = jnp.dot(pooled.astype(cdt), w1_ref[...],
                  preferred_element_type=jnp.float32) + b1_ref[...]
    hid = jnp.maximum(hid, 0.0)
    out = jnp.dot(hid.astype(cdt), w2_ref[...],
                  preferred_element_type=jnp.float32) + b2_ref[...]
    out_ref[...] = out.astype(out_ref.dtype)


# ----------------------------------------------------------------------------
# Wrapper
# ----------------------------------------------------------------------------
def _choose_bt(B, L, D, H, x_bytes, s_bytes, budget):
    """Pick a batch tile that fits the generation's VMEM and keeps >=2 tiles when B allows."""
    def lane(n):
        return _round_up(n, 128)

    def footprint(bt):
        return (2 * bt * L * lane(D) * x_bytes            # double-buffered x block
                + bt * L * lane(3 * H) * s_bytes)         # gate scratch (single-buffered)

    bt = 128 if B >= 128 else _round_up(max(B, 1), 8)
    if B >= 16 and _round_up(B, bt) // bt < 2:            # v7x: keep both TensorCores busy
        bt = _round_up(pl.cdiv(B, 2), 8)
    while bt > 8 and footprint(bt) > budget:
        bt = max(8, _round_up(bt // 2, 8))
    return bt


def dynamic_filter_forward(sequences, lengths, params, compute_dtype=jnp.bfloat16):
    """sequences: [B, L, D] (batch_first). lengths: [B] int.
    Returns (output [B, OUT], lengths) — mirrors DynamicFilter.forward."""
    B, L, D = sequences.shape
    H = params["w_hh"].shape[0]
    OUT = params["w2"].shape[1]
    cdt = compute_dtype

    # Generation-aware VMEM budget (v7x: 64 MiB physical; v5e/v6e: 128 MiB).
    try:
        vmem_cap = int(pltpu.get_tpu_info().vmem_capacity_bytes)
    except Exception:
        vmem_cap = 64 * 1024 * 1024                       # conservative fallback
    x_bytes = jnp.dtype(cdt).itemsize
    Bt = _choose_bt(B, L, D, H, x_bytes, 4, budget=int(0.6 * vmem_cap))
    B_pad = _round_up(B, Bt)
    n_tiles = B_pad // Bt

    # Lengths: padded column vector for the per-row mask + per-tile max (scalar prefetch / SMEM)
    lens_full = jnp.zeros((B_pad,), jnp.int32).at[:B].set(lengths.astype(jnp.int32))
    lens_col = lens_full[:, None]                                         # [B_pad, 1]
    tmax = jnp.minimum(jnp.max(lens_full.reshape(n_tiles, Bt), axis=1), L).astype(jnp.int32)

    # Input: pad batch, reorder to per-tile time-major slab [n_tiles*L*Bt, D] (wrapper-side —
    # free-ish XLA data movement, buys contiguous aligned per-step loads inside the recurrence).
    x = sequences.astype(cdt)
    if B_pad != B:
        x = jnp.pad(x, ((0, B_pad - B), (0, 0), (0, 0)))
    x2d = (x.reshape(n_tiles, Bt, L, D)
             .transpose(0, 2, 1, 3)
             .reshape(n_tiles * L * Bt, D))

    # Weights stay combined (r|z|n) so both matmuls are one wide MXU pass; cast to compute dtype.
    w_ih = params["w_ih"].astype(cdt)
    w_hh = params["w_hh"].astype(cdt)
    b_ih = params["b_ih"].astype(jnp.float32)
    b_hh = params["b_hh"].astype(jnp.float32)
    bias_gi = b_ih.at[:, :2 * H].add(b_hh[:, :2 * H])     # fold b_hr/b_hz; b_hn stays separate
    bhn = b_hh[:, 2 * H:]
    w1 = params["w1"].astype(cdt)
    b1 = params["b1"].astype(jnp.float32)
    w2 = params["w2"].astype(cdt)
    b2 = params["b2"].astype(jnp.float32)

    def const2d(a):
        return pl.BlockSpec(a.shape, lambda i, tmax_ref: (0, 0))

    out_pad = pl.pallas_call(
        fused_dynamic_filter_kernel,
        out_shape=jax.ShapeDtypeStruct((B_pad, OUT), jnp.float32),
        grid_spec=pltpu.PrefetchScalarGridSpec(
            num_scalar_prefetch=1,                        # tmax -> SMEM
            grid=(n_tiles,),
            in_specs=[
                pl.BlockSpec((L * Bt, D), lambda i, tmax_ref: (i, 0)),   # time-major x slab
                pl.BlockSpec((Bt, 1), lambda i, tmax_ref: (i, 0)),       # per-row lengths
                const2d(w_ih), const2d(bias_gi), const2d(w_hh), const2d(bhn),
                const2d(w1), const2d(b1), const2d(w2), const2d(b2),
            ],
            out_specs=pl.BlockSpec((Bt, OUT), lambda i, tmax_ref: (i, 0)),
            scratch_shapes=[pltpu.VMEM((L * Bt, 3 * H), jnp.float32)],   # single fused gate buffer
        ),
        compiler_params=pltpu.CompilerParams(
            dimension_semantics=("parallel",),            # batch tiles shard across TCs (v7x)
            vmem_limit_bytes=int(min(0.85 * vmem_cap, 110 * 1024 * 1024)),
        ),
    )(tmax, x2d, lens_col,
      w_ih, bias_gi, w_hh, bhn, w1, b1, w2, b2)

    return out_pad[:B], lengths


# ----------------------------------------------------------------------------
# Pure JAX reference (for correctness check)
# ----------------------------------------------------------------------------
def reference_forward(sequences, lengths, params):
    B, L, D = sequences.shape
    H = params["w_hh"].shape[0]

    def cell(h, x_t):
        gi = x_t @ params["w_ih"] + params["b_ih"]
        gh = h @ params["w_hh"] + params["b_hh"]
        i_r, i_z, i_n = gi[:, :H], gi[:, H:2 * H], gi[:, 2 * H:]
        h_r, h_z, h_n = gh[:, :H], gh[:, H:2 * H], gh[:, 2 * H:]
        r = jax.nn.sigmoid(i_r + h_r)
        z = jax.nn.sigmoid(i_z + h_z)
        n = jnp.tanh(i_n + r * h_n)
        h_new = (1.0 - z) * n + z * h
        return h_new, h_new

    h0 = jnp.zeros((B, H), jnp.float32)
    _, outs = jax.lax.scan(cell, h0, jnp.transpose(sequences, (1, 0, 2)))  # [L, B, H]

    mask = (jnp.arange(L)[:, None, None] < lengths[None, :, None]).astype(jnp.float32)
    pooled = jnp.sum(outs * mask, axis=0) / jnp.maximum(
        lengths.astype(jnp.float32)[:, None], 1.0)

    hid = jnp.maximum(pooled @ params["w1"] + params["b1"], 0.0)
    return hid @ params["w2"] + params["b2"]


# ----------------------------------------------------------------------------
# Main
# ----------------------------------------------------------------------------
if __name__ == "__main__":
    B, L, D, H, OUT = 2, 8, 32, 32, 32

    key = jax.random.PRNGKey(0)
    keys = jax.random.split(key, 9)
    s = 0.1
    params = {
        "w_ih": s * jax.random.normal(keys[0], (D, 3 * H), jnp.float32),
        "w_hh": s * jax.random.normal(keys[1], (H, 3 * H), jnp.float32),
        "b_ih": s * jax.random.normal(keys[2], (1, 3 * H), jnp.float32),
        "b_hh": s * jax.random.normal(keys[3], (1, 3 * H), jnp.float32),
        "w1":   s * jax.random.normal(keys[4], (H, H), jnp.float32),
        "b1":   s * jax.random.normal(keys[5], (1, H), jnp.float32),
        "w2":   s * jax.random.normal(keys[6], (H, OUT), jnp.float32),
        "b2":   s * jax.random.normal(keys[7], (1, OUT), jnp.float32),
    }

    sequences = jax.random.normal(keys[8], (B, L, D), jnp.float32)
    lengths = jnp.array([8, 5], dtype=jnp.int32)

    out, lens_out = dynamic_filter_forward(sequences, lengths, params,
                                           compute_dtype=jnp.bfloat16)
    out = jax.block_until_ready(out)

    ref = reference_forward(sequences, lengths, params)
    assert out.shape == (B, OUT)
    # tolerance accounts for bf16 MXU inputs (f32 accumulation) vs. the f32 reference
    assert jnp.allclose(out, ref, rtol=3e-2, atol=3e-2), "mismatch vs reference"

    print("KERNEL_OK")
</pallas_src>

<mosaic_0001>
module attributes {stable_mosaic.version = 11 : i64} {
  func.func @fused_dynamic_filter_kernel(%arg0: i32, %arg1: memref<1xi32, #tpu.memory_space<smem>>, %arg2: memref<64x32xbf16, #tpu.memory_space<vmem>>, %arg3: memref<8x1xi32, #tpu.memory_space<vmem>>, %arg4: memref<32x96xbf16, #tpu.memory_space<vmem>>, %arg5: memref<1x96xf32, #tpu.memory_space<vmem>>, %arg6: memref<32x96xbf16, #tpu.memory_space<vmem>>, %arg7: memref<1x32xf32, #tpu.memory_space<vmem>>, %arg8: memref<32x32xbf16, #tpu.memory_space<vmem>>, %arg9: memref<1x32xf32, #tpu.memory_space<vmem>>, %arg10: memref<32x32xbf16, #tpu.memory_space<vmem>>, %arg11: memref<1x32xf32, #tpu.memory_space<vmem>>, %arg12: memref<8x32xf32, #tpu.memory_space<vmem>>, %arg13: memref<64x96xf32, #tpu.memory_space<vmem>>) attributes {dimension_semantics = [#tpu.dimension_semantics<parallel>], iteration_bounds = array<i64: 1>, scalar_prefetch = 1 : i64, scratch_operands = 1 : i64, tpu.core_type = #tpu.core_type<tc>, window_params = [{transform_indices = @transform_0, window_bounds = array<i64: 64, 32>}, {transform_indices = @transform_1, window_bounds = array<i64: 8, 1>}, {pipeline_mode = #tpu.pipeline_mode<synchronous>, transform_indices = @transform_2, window_bounds = array<i64: 32, 96>}, {pipeline_mode = #tpu.pipeline_mode<synchronous>, transform_indices = @transform_3, window_bounds = array<i64: 1, 96>}, {pipeline_mode = #tpu.pipeline_mode<synchronous>, transform_indices = @transform_4, window_bounds = array<i64: 32, 96>}, {pipeline_mode = #tpu.pipeline_mode<synchronous>, transform_indices = @transform_5, window_bounds = array<i64: 1, 32>}, {pipeline_mode = #tpu.pipeline_mode<synchronous>, transform_indices = @transform_6, window_bounds = array<i64: 32, 32>}, {pipeline_mode = #tpu.pipeline_mode<synchronous>, transform_indices = @transform_7, window_bounds = array<i64: 1, 32>}, {pipeline_mode = #tpu.pipeline_mode<synchronous>, transform_indices = @transform_8, window_bounds = array<i64: 32, 32>}, {pipeline_mode = #tpu.pipeline_mode<synchronous>, transform_indices = @transform_9, window_bounds = array<i64: 1, 32>}, {transform_indices = @transform_10, window_bounds = array<i64: 8, 32>}]} {
    %c0 = arith.constant 0 : index
    %c0_0 = arith.constant 0 : index
    %0 = vector.load %arg2[%c0, %c0_0] : memref<64x32xbf16, #tpu.memory_space<vmem>>, vector<64x32xbf16>
    %c0_1 = arith.constant 0 : index
    %c0_2 = arith.constant 0 : index
    %1 = vector.load %arg4[%c0_1, %c0_2] : memref<32x96xbf16, #tpu.memory_space<vmem>>, vector<32x96xbf16>
    %cst = arith.constant dense<0.000000e+00> : vector<64x96xf32>
    %2 = tpu.matmul %0, %1, %cst {dimension_numbers = #tpu.dot_dimension_numbers<[1], [0], [0], [1], [0, 0, 1, 1], [], []>} : vector<64x32xbf16>, vector<32x96xbf16>, vector<64x96xf32> -> vector<64x96xf32>
    %c0_3 = arith.constant 0 : index
    %c0_4 = arith.constant 0 : index
    %3 = vector.load %arg5[%c0_3, %c0_4] : memref<1x96xf32, #tpu.memory_space<vmem>>, vector<1x96xf32>
    %4 = vector.broadcast %3 : vector<1x96xf32> to vector<64x96xf32>
    %5 = arith.addf %2, %4 : vector<64x96xf32>
    %c0_5 = arith.constant 0 : index
    %c0_6 = arith.constant 0 : index
    %6 = vector.load %arg13[%c0_5, %c0_6] : memref<64x96xf32, #tpu.memory_space<vmem>>, vector<64x96xf32>
    tpu.vector_store %arg13[%c0_5, %c0_6], %5 {strides = array<i32>} : memref<64x96xf32, #tpu.memory_space<vmem>>, vector<64x96xf32>,
    %c0_7 = arith.constant 0 : index
    %c0_8 = arith.constant 0 : index
    %7 = vector.load %arg6[%c0_7, %c0_8] : memref<32x96xbf16, #tpu.memory_space<vmem>>, vector<32x96xbf16>
    %c0_9 = arith.constant 0 : index
    %c0_10 = arith.constant 0 : index
    %8 = vector.load %arg7[%c0_9, %c0_10] : memref<1x32xf32, #tpu.memory_space<vmem>>, vector<1x32xf32>
    %9 = vector.shape_cast %8 : vector<1x32xf32> to vector<1x32xf32>
    %10 = vector.broadcast %9 : vector<1x32xf32> to vector<8x32xf32>
    %c0_11 = arith.constant 0 : index
    %c0_12 = arith.constant 0 : index
    %11 = vector.load %arg3[%c0_11, %c0_12] : memref<8x1xi32, #tpu.memory_space<vmem>>, vector<8x1xi32>
    %12 = arith.index_cast %arg0 : i32 to index
    %13 = memref.load %arg1[%12] : memref<1xi32, #tpu.memory_space<smem>>
    %cst_13 = arith.constant 0.000000e+00 : f32
    %14 = vector.broadcast %cst_13 : f32 to vector<8x32xf32>
    %cst_14 = arith.constant 0.000000e+00 : f32
    %15 = vector.broadcast %cst_14 : f32 to vector<8x32xf32>
    %c0_i32 = arith.constant 0 : i32
    %16 = arith.subi %13, %c0_i32 : i32
    %17 = arith.addi %c0_i32, %16 : i32
    %c1_i32 = arith.constant 1 : i32
    %18:2 = scf.for %arg14 = %c0_i32 to %17 step %c1_i32 iter_args(%arg15 = %14, %arg16 = %15) -> (vector<8x32xf32>, vector<8x32xf32>)  : i32 {
      %c8_i32 = arith.constant 8 : i32
      %41 = arith.muli %arg14, %c8_i32 : i32
      %42 = tpu.assume_multiple %41, 8 : i32
      %43 = arith.index_cast %42 : i32 to index
      %c0_30 = arith.constant 0 : index
      %44 = vector.load %arg13[%43, %c0_30] : memref<64x96xf32, #tpu.memory_space<vmem>>, vector<8x96xf32>
      %45 = arith.truncf %arg15 : vector<8x32xf32> to vector<8x32xbf16>
      %cst_31 = arith.constant dense<0.000000e+00> : vector<8x96xf32>
      %46 = tpu.matmul %45, %7, %cst_31 {dimension_numbers = #tpu.dot_dimension_numbers<[1], [0], [0], [1], [0, 0, 1, 1], [], []>} : vector<8x32xbf16>, vector<32x96xbf16>, vector<8x96xf32> -> vector<8x96xf32>
      %47 = vector.extract_strided_slice %44 {offsets = [0, 0], sizes = [8, 64], strides = [1, 1]} : vector<8x96xf32> to vector<8x64xf32>
      %48 = vector.extract_strided_slice %46 {offsets = [0, 0], sizes = [8, 64], strides = [1, 1]} : vector<8x96xf32> to vector<8x64xf32>
      %49 = arith.addf %47, %48 : vector<8x64xf32>
      %50 = arith.negf %49 : vector<8x64xf32>
      %51 = math.exp %50 : vector<8x64xf32>
      %cst_32 = arith.constant 1.000000e+00 : f32
      %52 = vector.broadcast %cst_32 : f32 to vector<8x64xf32>
      %53 = arith.addf %52, %51 : vector<8x64xf32>
      %54 = arith.divf %52, %53 : vector<8x64xf32>
      %55 = vector.extract_strided_slice %54 {offsets = [0, 0], sizes = [8, 32], strides = [1, 1]} : vector<8x64xf32> to vector<8x32xf32>
      %56 = vector.extract_strided_slice %54 {offsets = [0, 32], sizes = [8, 32], strides = [1, 1]} : vector<8x64xf32> to vector<8x32xf32>
      %57 = vector.extract_strided_slice %44 {offsets = [0, 64], sizes = [8, 32], strides = [1, 1]} : vector<8x96xf32> to vector<8x32xf32>
      %58 = vector.extract_strided_slice %46 {offsets = [0, 64], sizes = [8, 32], strides = [1, 1]} : vector<8x96xf32> to vector<8x32xf32>
      %59 = arith.addf %58, %10 : vector<8x32xf32>
      %60 = arith.mulf %55, %59 : vector<8x32xf32>
      %61 = arith.addf %57, %60 : vector<8x32xf32>
      %62 = math.tanh %61 : vector<8x32xf32>
      %cst_33 = arith.constant 1.000000e+00 : f32
      %63 = vector.broadcast %cst_33 : f32 to vector<8x32xf32>
      %64 = arith.subf %63, %56 : vector<8x32xf32>
      %65 = arith.mulf %64, %62 : vector<8x32xf32>
      %66 = arith.mulf %56, %arg15 : vector<8x32xf32>
      %67 = arith.addf %65, %66 : vector<8x32xf32>
      %68 = vector.broadcast %arg14 : i32 to vector<8x1xi32>
      %69 = arith.cmpi slt, %68, %11 : vector<8x1xi32>
      %70 = arith.extui %69 : vector<8x1xi1> to vector<8x1xi32>
      %71 = arith.sitofp %70 : vector<8x1xi32> to vector<8x1xf32>
      %72 = vector.broadcast %71 : vector<8x1xf32> to vector<8x32xf32>
      %73 = arith.mulf %72, %67 : vector<8x32xf32>
      %74 = arith.addf %arg16, %73 : vector<8x32xf32>
      scf.yield %67, %74 : vector<8x32xf32>, vector<8x32xf32>
    }
    %19 = arith.sitofp %11 : vector<8x1xi32> to vector<8x1xf32>
    %cst_15 = arith.constant 1.000000e+00 : f32
    %20 = vector.broadcast %cst_15 : f32 to vector<8x1xf32>
    %21 = arith.maximumf %19, %20 : vector<8x1xf32>
    %cst_16 = arith.constant 1.000000e+00 : f32
    %22 = vector.broadcast %cst_16 : f32 to vector<8x1xf32>
    %23 = arith.divf %22, %21 : vector<8x1xf32>
    %24 = vector.broadcast %23 : vector<8x1xf32> to vector<8x32xf32>
    %25 = arith.mulf %18#1, %24 : vector<8x32xf32>
    %26 = arith.truncf %25 : vector<8x32xf32> to vector<8x32xbf16>
    %c0_17 = arith.constant 0 : index
    %c0_18 = arith.constant 0 : index
    %27 = vector.load %arg8[%c0_17, %c0_18] : memref<32x32xbf16, #tpu.memory_space<vmem>>, vector<32x32xbf16>
    %cst_19 = arith.constant dense<0.000000e+00> : vector<8x32xf32>
    %28 = tpu.matmul %26, %27, %cst_19 {dimension_numbers = #tpu.dot_dimension_numbers<[1], [0], [0], [1], [0, 0, 1, 1], [], []>} : vector<8x32xbf16>, vector<32x32xbf16>, vector<8x32xf32> -> vector<8x32xf32>
    %c0_20 = arith.constant 0 : index
    %c0_21 = arith.constant 0 : index
    %29 = vector.load %arg9[%c0_20, %c0_21] : memref<1x32xf32, #tpu.memory_space<vmem>>, vector<1x32xf32>
    %30 = vector.broadcast %29 : vector<1x32xf32> to vector<8x32xf32>
    %31 = arith.addf %28, %30 : vector<8x32xf32>
    %cst_22 = arith.constant 0.000000e+00 : f32
    %32 = vector.broadcast %cst_22 : f32 to vector<8x32xf32>
    %33 = arith.maximumf %31, %32 : vector<8x32xf32>
    %34 = arith.truncf %33 : vector<8x32xf32> to vector<8x32xbf16>
    %c0_23 = arith.constant 0 : index
    %c0_24 = arith.constant 0 : index
    %35 = vector.load %arg10[%c0_23, %c0_24] : memref<32x32xbf16, #tpu.memory_space<vmem>>, vector<32x32xbf16>
    %cst_25 = arith.constant dense<0.000000e+00> : vector<8x32xf32>
    %36 = tpu.matmul %34, %35, %cst_25 {dimension_numbers = #tpu.dot_dimension_numbers<[1], [0], [0], [1], [0, 0, 1, 1], [], []>} : vector<8x32xbf16>, vector<32x32xbf16>, vector<8x32xf32> -> vector<8x32xf32>
    %c0_26 = arith.constant 0 : index
    %c0_27 = arith.constant 0 : index
    %37 = vector.load %arg11[%c0_26, %c0_27] : memref<1x32xf32, #tpu.memory_space<vmem>>, vector<1x32xf32>
    %38 = vector.broadcast %37 : vector<1x32xf32> to vector<8x32xf32>
    %39 = arith.addf %36, %38 : vector<8x32xf32>
    %c0_28 = arith.constant 0 : index
    %c0_29 = arith.constant 0 : index
    %40 = vector.load %arg12[%c0_28, %c0_29] : memref<8x32xf32, #tpu.memory_space<vmem>>, vector<8x32xf32>
    tpu.vector_store %arg12[%c0_28, %c0_29], %39 {strides = array<i32>} : memref<8x32xf32, #tpu.memory_space<vmem>>, vector<8x32xf32>,
    return
  }
  func.func @transform_0(%arg0: i32, %arg1: memref<1xi32, #tpu.memory_space<smem>>) -> (i32, i32) {
    %c0_i32 = arith.constant 0 : i32
    %c0_i32_0 = arith.constant 0 : i32
    return %arg0, %c0_i32 : i32, i32
  }
  func.func @transform_1(%arg0: i32, %arg1: memref<1xi32, #tpu.memory_space<smem>>) -> (i32, i32) {
    %c0_i32 = arith.constant 0 : i32
    %c0_i32_0 = arith.constant 0 : i32
    return %arg0, %c0_i32 : i32, i32
  }
  func.func @transform_2(%arg0: i32, %arg1: memref<1xi32, #tpu.memory_space<smem>>) -> (i32, i32) {
    %c0_i32 = arith.constant 0 : i32
    %c0_i32_0 = arith.constant 0 : i32
    %c0_i32_1 = arith.constant 0 : i32
    return %c0_i32, %c0_i32_0 : i32, i32
  }
  func.func @transform_3(%arg0: i32, %arg1: memref<1xi32, #tpu.memory_space<smem>>) -> (i32, i32) {
    %c0_i32 = arith.constant 0 : i32
    %c0_i32_0 = arith.constant 0 : i32
    %c0_i32_1 = arith.constant 0 : i32
    return %c0_i32, %c0_i32_0 : i32, i32
  }
  func.func @transform_4(%arg0: i32, %arg1: memref<1xi32, #tpu.memory_space<smem>>) -> (i32, i32) {
    %c0_i32 = arith.constant 0 : i32
    %c0_i32_0 = arith.constant 0 : i32
    %c0_i32_1 = arith.constant 0 : i32
    return %c0_i32, %c0_i32_0 : i32, i32
  }
  func.func @transform_5(%arg0: i32, %arg1: memref<1xi32, #tpu.memory_space<smem>>) -> (i32, i32) {
    %c0_i32 = arith.constant 0 : i32
    %c0_i32_0 = arith.constant 0 : i32
    %c0_i32_1 = arith.constant 0 : i32
    return %c0_i32, %c0_i32_0 : i32, i32
  }
  func.func @transform_6(%arg0: i32, %arg1: memref<1xi32, #tpu.memory_space<smem>>) -> (i32, i32) {
    %c0_i32 = arith.constant 0 : i32
    %c0_i32_0 = arith.constant 0 : i32
    %c0_i32_1 = arith.constant 0 : i32
    return %c0_i32, %c0_i32_0 : i32, i32
  }
  func.func @transform_7(%arg0: i32, %arg1: memref<1xi32, #tpu.memory_space<smem>>) -> (i32, i32) {
    %c0_i32 = arith.constant 0 : i32
    %c0_i32_0 = arith.constant 0 : i32
    %c0_i32_1 = arith.constant 0 : i32
    return %c0_i32, %c0_i32_0 : i32, i32
  }
  func.func @transform_8(%arg0: i32, %arg1: memref<1xi32, #tpu.memory_space<smem>>) -> (i32, i32) {
    %c0_i32 = arith.constant 0 : i32
    %c0_i32_0 = arith.constant 0 : i32
    %c0_i32_1 = arith.constant 0 : i32
    return %c0_i32, %c0_i32_0 : i32, i32
  }
  func.func @transform_9(%arg0: i32, %arg1: memref<1xi32, #tpu.memory_space<smem>>) -> (i32, i32) {
    %c0_i32 = arith.constant 0 : i32
    %c0_i32_0 = arith.constant 0 : i32
    %c0_i32_1 = arith.constant 0 : i32
    return %c0_i32, %c0_i32_0 : i32, i32
  }
  func.func @transform_10(%arg0: i32, %arg1: memref<1xi32, #tpu.memory_space<smem>>) -> (i32, i32) {
    %c0_i32 = arith.constant 0 : i32
    %c0_i32_0 = arith.constant 0 : i32
    return %arg0, %c0_i32 : i32, i32
  }
}

</mosaic_0001>

<bundles_post_ra>
// kernel: tpu_custom_call.1
= control target key start
LH: loop header
LB: loop body
LE: loop exit
PB: predicated region body
PF: predicated region fallthrough
CT: control target
= control target key end

     0   :  { %17 = vsyncpa [#allocation6], 0  ;;  %vm90_vm0 = vcmask 261120   ;;  %vm168_vm1 = vcmask 785408   ;;  %v812_v29 = vmov 0.0   ;;  %s883_s0 = inlined_call_operand.<no memory space> [shape: s32[1], index: 0, kind: input, shape index: {}]   ;;  %s884_s1 = inlined_call_operand.vmem [shape: bf16[64,32], index: 1, kind: input, shape index: {}]   ;;  %s885_s2 = inlined_call_operand.vmem [shape: s32[8,1], index: 2, kind: input, shape index: {}]   ;;  %s886_s3 = inlined_call_operand.vmem [shape: bf16[32,96], index: 3, kind: input, shape index: {}]   ;;  %s887_s4 = inlined_call_operand.vmem [shape: f32[1,96], index: 4, kind: input, shape index: {}]   ;;  %s888_s5 = inlined_call_operand.vmem [shape: bf16[32,96], index: 5, kind: input, shape index: {}]   ;;  %s889_s6 = inlined_call_operand.vmem [shape: f32[1,32], index: 6, kind: input, shape index: {}]   ;;  %s890_s7 = inlined_call_operand.vmem [shape: bf16[32,32], index: 7, kind: input, shape index: {}]   ;;  %s891_s8 = inlined_call_operand.vmem [shape: f32[1,32], index: 8, kind: input, shape index: {}]   ;;  %s892_s9 = inlined_call_operand.vmem [shape: bf16[32,32], index: 9, kind: input, shape index: {}]   ;;  %s893_s10 = inlined_call_operand.vmem [shape: f32[1,32], index: 10, kind: input, shape index: {}]   ;;  %s894_s11 = inlined_call_operand.hbm [shape: f32[8,32], index: 11, kind: output, shape index: {}]  }
   0x1   :  { %v600_v0 = vld [vmem:[%s886_s3] sm:$0xff]   ;;  %v601_v1 = vld [vmem:[%s886_s3 + $0x8] sm:$0xff]   ;;  %v603_v3 = vld [vmem:[%s884_s1 + $0x10] sm:$0xff]   ;;  %p488_p0 = scmp.le.s32.totalorder %s883_s0, 0 }
   0x2   :  { %518 = vmatprep.subr.bf16.mxu0 %v600_v0  ;;  %554 = vmatprep.subr.bf16.mxu1 %v600_v0  ;;  %v602_v2 = vld [vmem:[%s884_s1] sm:$0xff]   ;;  %v604_v4 = vld [vmem:[%s884_s1 + $0x8] sm:$0xff]   ;;  %v605_v5 = vld [vmem:[%s884_s1 + $0x18] sm:$0xff]   ;;  %v814_v30 = vmov (!%p488_p0), 0.0   ;;  %v816_v31 = vmov (!%p488_p0), 0.0  }
   0x3   :  { %519 = vmatpush3.bf16.msra.mxu0 %v600_v0  ;;  %556 = vmatpush3.bf16.msra.mxu1 %v600_v0  ;;  %v771_v6 = vld [vmem:[%s888_s5] sm:$0xf]  ;;  %v776_v7 = vld [vmem:[%s888_s5 + $0x4] sm:$0xf]  ;;  %v781_v8 = vld [vmem:[%s888_s5 + $0x8] sm:$0xf] }
   0x4   :  { %520 = vmatprep.subr.bf16.mxu0 %v601_v1  ;;  %555 = vmatprep.subr.bf16.mxu1 %v601_v1  ;;  %v786_v9 = vld [vmem:[%s888_s5 + $0xc] sm:$0xf]  ;;  %v791_v10 = vld [vmem:[%s889_s6] ss:$0 sm:$0xff]  ;;  %s818_s5 = smov (!%p488_p0), 0  }
   0x5   :  { %522 = vmatprep.mubr.msk.bf16.mxu0 %vm90_vm0, %v602_v2  ;;  %526 = vmatprep.mubr.msk.bf16.mxu1 %vm90_vm0, %v603_v3  ;;  %v796_v11 = vld [vmem:[%s885_s2] sm:$0xff] }
   0x6   :  { %v476_v12 = vld [vmem:[%s887_s4] ss:$0 sm:$0xff] }
   0x7   :  { %521 = vmatpush3.bf16.msra.mxu0 %v601_v1  ;;  %557 = vmatpush3.bf16.msra.mxu1 %v601_v1 }
   0xa   :  { %523 = vmatmul.mubr.msk.bf16.vlgmr.msra.gmra.mrb[0].mxu0 %vm90_vm0, %v604_v4  ;;  %527 = vmatmul.mubr.msk.bf16.vlgmr.msra.gmra.mrb[0].mxu1 %vm90_vm0, %v605_v5 }
  0xdd   :  { %v524_v13 = vpop.f32.mrb[0].mxu0  ;;  %v528_v14 = vpop.f32.mrb[0].mxu1  ;;  %469 = sbr.rel (%p488_p0) target bundleno = 929 (0x3a1), region = 62 }
  0xde   :  { %v146_v15 = vadd.f32 %v524_v13, %v476_v12  ;;  %v162_v16 = vadd.f32 %v528_v14, %v476_v12  ;;  %v137_v17 = vpop.f32.mrb[1].mxu0  ;;  %v153_v18 = vpop.f32.mrb[1].mxu1 }
  0xdf   :  { %v138_v19 = vadd.f32 %v476_v12, %v137_v17  ;;  %v154_v20 = vadd.f32 %v476_v12, %v153_v18  ;;  %v525_v21 = vpop.f32.mrb[2].mxu0  ;;  %v529_v22 = vpop.f32.mrb[2].mxu1 }
  0xe0   :  { %171 = vst.msk [vmem:[#allocation2 + $0x10] sm:$0xff] %vm168_vm1, %v146_v15  ;;  %175 = vst.msk [vmem:[#allocation2 + $0x30] sm:$0xff] %vm168_vm1, %v162_v16  ;;  %v149_v23 = vadd.f32 %v525_v21, %v476_v12  ;;  %v165_v24 = vadd.f32 %v529_v22, %v476_v12  ;;  %v140_v25 = vpop.f32.mrb[3].mxu0  ;;  %v156_v26 = vpop.f32.mrb[3].mxu1 }
  0xe1   :  { %169 = vst.msk [vmem:[#allocation2] sm:$0xff] %vm168_vm1, %v138_v19  ;;  %173 = vst.msk [vmem:[#allocation2 + $0x20] sm:$0xff] %vm168_vm1, %v154_v20  ;;  %v141_v27 = vadd.f32 %v476_v12, %v140_v25  ;;  %v157_v28 = vadd.f32 %v476_v12, %v156_v26 }
  0xe2   :  { %172 = vst.msk [vmem:[#allocation2 + $0x18] sm:$0xff] %vm168_vm1, %v149_v23  ;;  %176 = vst.msk [vmem:[#allocation2 + $0x38] sm:$0xff] %vm168_vm1, %v165_v24 }
  0xe3   :  { %170 = vst.msk [vmem:[#allocation2 + $0x8] sm:$0xff] %vm168_vm1, %v141_v27  ;;  %174 = vst.msk [vmem:[#allocation2 + $0x28] sm:$0xff] %vm168_vm1, %v157_v28 }
  0xe4 LB: > { %v490_v32 = vcombine.low %v771_v6, %v776_v7  ;;  %v676_v33 = vmov 0.0   ;;  %v200_v34 = vpack.c.bf16 %v666_v31, %v666_v31  ;;  %v491_v35 = vcombine.low %v781_v8, %v786_v9  ;;  %s678_s6 = smov 96   ;;  %s679_s22 = smov 64   ;;  %s670_s5 = sphi %s818_s5, %s192_s5   ;;  %v666_v31 = vphi %v816_v31, %v288_v31   ;;  %v662_v30 = vphi %v814_v30, %v895_v30  }
  0xe5   : > { %530 = vmatprep.subr.bf16.mxu0 %v676_v33  ;;  %vm677_vm2 = vmmov 0   ;;  %s489_s23 = sshll.u32 %s670_s5, 3  ;;  %v289_v48 = vstv %s670_s5  ;;  %v680_v49 = vmov 0   ;;  %s192_s5 = sadd.s32 1, %s670_s5  }
  0xe6   : > { %531 = vmatpush3.bf16.msra.mxu0 %v490_v32  ;;  %534 = vmatprep.mubr.msk.bf16.mxu0 %vm677_vm2, %v676_v33  ;;  %s198_s24 = scalar_lea.vmem [#allocation2], %s489_s23  ;;  %vm290_vm3 = vcmp.lt.s32.totalorder %v289_v48, %v796_v11  ;;  %p191_p1 = scmp.ge.s32.totalorder %s192_s5, %s883_s0 }
  0xe7   : > { %532 = vmatprep.subr.bf16.mxu0 %v676_v33  ;;  %202 = vrot.lane.b32.xlu0 %v200_v34, %s678_s6  ;;  %v494_v50 = vsel %vm290_vm3, 1.0, %v676_v33 }
  0xe8   : > { %606 = vset.pattern.permute.xlu0 %v680_v49 }
  0xea   : > { %533 = vmatpush3.bf16.msra.mxu0 %v491_v35  ;;  %v199_v43 = vld [vmem:[%s198_s24] sm:$0xff] }
  0xeb   : > { %266 = vrot.lane.b32.xlu0 %v791_v10, %s679_s22 }
  0xef   : > { %295 = vperm.xlu0 %606, %v494_v50  }
 0x159   : > { %v203_v36 = vpop.permute.xlu0 %202 }
 0x15a   : > { %535 = vmatmul.mubr.msk.bf16.vlgmr.msra.gmra.mrb[0].mxu0 %vm90_vm0, %v203_v36 }
 0x15d   : > { %v267_v37 = vpop.permute.xlu0 %266 }
 0x16e   : > { %v296_v61 = vpop.permute.xlu0 %295 }
 0x22d   : > { %v253_v38 = vpop.f32.mrb[0].mxu0 }
 0x22e   : > { %v269_v39 = vadd.f32 %v267_v37, %v253_v38  ;;  %v536_v40 = vpop.f32.mrb[1].mxu0  ;;  %v259_v44 = vadd.f32 %v253_v38, %v199_v43 }
 0x22f   : > { %v256_v41 = vpop.f32.mrb[2].mxu0 }
 0x230   : > { %v537_v42 = vpop.f32.mrb[3].mxu0  ;;  %271 = vrot.lane.b32.xlu1 %v269_v39, %s679_s22  ;;  %v493_v45 = vmul.f32 -1.442695, %v259_v44 }
 0x232   : > { %607 = vpow2.f32 %v493_v45 }
 0x23c   : > { %v608_v46 = vpop.eup %607 }
 0x23d   : > { %v263_v47 = vadd.f32 1.0, %v608_v46 }
 0x23f   : > { %609 = vrcp.f32 %v263_v47 }
 0x249   : > { %v610_v51 = vpop.eup %609 }
 0x24a   : > { %v281_v57 = vsub.f32 1.0, %v610_v51  ;;  %v287_v60 = vmul.f32 %v666_v31, %v610_v51 }
 0x2a2   : > { %v272_v52 = vpop.permute.xlu1 %271 }
 0x2a3   : > { %v274_v53 = vmul.f32 %v610_v51, %v272_v52 }
 0x2a5   : > { %276 = vrot.lane.b32.xlu1 %v274_v53, %s679_s22 }
 0x317   : > { %v277_v54 = vpop.permute.xlu1 %276 }
 0x318   : > { %v279_v55 = vadd.f32 %v277_v54, %v199_v43 }
 0x31a   : > { %611 = vtanh.f32 %v279_v55 }
 0x324   : > { %v612_v56 = vpop.eup %611 }
 0x325   : > { %283 = vrot.lane.b32.xlu1 %v612_v56, %s678_s6 }
 0x397   : > { %v284_v58 = vpop.permute.xlu1 %283 }
 0x398   : > { %v286_v59 = vmul.f32 %v284_v58, %v281_v57 }
 0x39a   : > { %v288_v31 = vadd.f32 %v287_v60, %v286_v59   ;;  %194 = sbr.rel (!%p191_p1) target bundleno = 228 (0xe4), region = 68 }
 0x39c   : > { %v298_v62 = vmul.f32 %v296_v61, %v288_v31 }
 0x39e   : > { %v299_v63 = vadd.f32 %v662_v30, %v298_v62  }
 0x3a0   : > { %v895_v30 = vmov %v299_v63  ;;  %v896_v29 = vmov (%p191_p1), %v299_v63 }
 0x3a1 PF:  { %v300_v0 = vcvt.s32.f32 %v796_v11  ;;  %v681_v1 = vmov 0   ;;  %v614_v4 = vld [vmem:[%s890_s7] sm:$0xff]   ;;  %v682_v5 = vmov 0.0   ;;  %vm683_vm4 = vmmov 0   ;;  %v615_v6 = vld [vmem:[%s890_s7 + $0x8] sm:$0xff]   ;;  %s684_s29 = smov 96   ;;  %v674_v29 = vphi %v812_v29, %v896_v29  }
 0x3a2   :  { %613 = vset.pattern.permute.xlu0 %v681_v1  ;;  %538 = vmatprep.subr.bf16.mxu0 %v682_v5  ;;  %v616_v11 = vld [vmem:[%s892_s9] sm:$0xff]   ;;  %v617_v12 = vld [vmem:[%s892_s9 + $0x8] sm:$0xff]   ;;  %s685_s17 = smov [#allocation5]  }
 0x3a3   :  { %v301_v2 = vmax.f32 %v300_v0, 1.0  ;;  %542 = vmatprep.mubr.msk.bf16.mxu0 %vm683_vm4, %v682_v5  ;;  %539 = vmatpush3.bf16.msra.mxu0 %v614_v4  ;;  %v495_v13 = vld [vmem:[%s891_s8] ss:$0 sm:$0xff]  ;;  %s455_s9 = sshll.u32 %s685_s17, 4  ;;  %s456_s9 = int_to_ptr.vmem [resolvable:$true] %s455_s9 }
 0x3a4   :  { %546 = vmatprep.subr.bf16.mxu1 %v682_v5  ;;  %540 = vmatprep.subr.bf16.mxu0 %v682_v5  ;;  %v499_v21 = vld [vmem:[%s893_s10] ss:$0 sm:$0xff]  ;;  %s620_s8 = scalar_lea.vmem %s456_s9, 128  ;;  %p625_p3 = scmp.lt.s32.totalorder %s456_s9, %s456_s9 }
 0x3a5   :  { %618 = vrcp.f32 %v301_v2  ;;  %550 = vmatprep.mubr.msk.bf16.mxu1 %vm683_vm4, %v682_v5  ;;  %547 = vmatpush3.bf16.msra.mxu1 %v616_v11  ;;  %p621_p2 = scmp.ne.s32.totalorder %s456_s9, %s620_s8  ;;  %p626_p4 = scmp.lt.s32.totalorder %s620_s8, %s620_s8 }
 0x3a6   :  { %548 = vmatprep.subr.bf16.mxu1 %v682_v5 }
 0x3a7   :  { %541 = vmatpush3.bf16.msra.mxu0 %v615_v6  ;;  %p627_p5 = por %p626_p4, %p625_p3 }
 0x3a9   :  { %549 = vmatpush3.bf16.msra.mxu1 %v617_v12  ;;  %p628_p6 = pnand %p627_p5, %p621_p2 }
 0x3af   :  { %v619_v3 = vpop.eup %618 }
 0x3b0   :  { %306 = vperm.xlu0 %613, %v619_v3  }
 0x42f   :  { %v307_v7 = vpop.permute.xlu0 %306 }
 0x430   :  { %v309_v8 = vmul.f32 %v674_v29, %v307_v7 }
 0x432   :  { %v310_v9 = vpack.c.bf16 %v309_v8, %v309_v8 }
 0x434   :  { %323 = vrot.lane.b32.xlu0 %v310_v9, %s684_s29 }
 0x4a6   :  { %v324_v10 = vpop.permute.xlu0 %323 }
 0x4a7   :  { %543 = vmatmul.mubr.msk.bf16.vlgmr.msra.gmra.mrb[0].mxu0 %vm90_vm0, %v324_v10 }
 0x57a   :  { %v374_v14 = vpop.f32.mrb[0].mxu0 }
 0x57b   :  { %v375_v15 = vadd.f32 %v495_v13, %v374_v14  ;;  %v544_v16 = vpop.f32.mrb[1].mxu0 }
 0x57c   :  { %v377_v17 = vpop.f32.mrb[2].mxu0 }
 0x57d   :  { %v380_v18 = vmax.f32 %v375_v15, 0.0  ;;  %v545_v19 = vpop.f32.mrb[3].mxu0 }
 0x57f   :  { %v381_v20 = vpack.c.bf16 %v380_v18, %v380_v18 }
 0x581   :  { %551 = vmatmul.mubr.msk.bf16.vlgmr.msra.gmra.mrb[0].mxu1 %vm90_vm0, %v381_v20 }
 0x654   :  { %v442_v22 = vpop.f32.mrb[0].mxu1 }
 0x655   :  { %v443_v23 = vadd.f32 %v499_v21, %v442_v22  ;;  %v552_v24 = vpop.f32.mrb[1].mxu1 }
 0x656   :  { %v445_v25 = vpop.f32.mrb[2].mxu1 }
 0x657   :  { %448 = vst.msk [vmem:[#allocation5] sm:$0xff] %vm90_vm0, %v443_v23  ;;  %v553_v26 = vpop.f32.mrb[3].mxu1 }
 0x658   :  { %631 = shalt.err (!%p628_p6)
}
 0x659   :  { %s632_s10 = scalar_lea.hbm %s894_s11, 128 }
 0x65a   :  { %p633_p7 = scmp.ne.s32.totalorder %s894_s11, %s632_s10  ;;  %p636_p8 = scmp.lt.u32.totalorder %s632_s10, %s894_s11 }
 0x65c   :  { %p638_p9 = pnand %p636_p8, %p633_p7 }
 0x65e   :  { %641 = shalt.err (!%p638_p9)
}
 0x65f   :  { %458 = dma.vmem_to_hbm [thread:$0]  %s456_s9, 128, %s894_s11, [#allocation6]  }
 0x660   :  { %658 = dma.done.wait [#allocation6], 128  }
 0x661   :  { %659 = vsyncadd [#allocation6], 4294967168 }
 0x662   :  { %462 = vsyncpa [#allocation6], 1 }

</bundles_post_ra>
